<compile_context>
chip_gen: v5e
topology: v5e:2x2
jax: 0.10.0
libtpu: 0.0.40
codegen_flags: <defaults>
</compile_context>

<pallas_src>
from functools import partial

import numpy as np
import jax
import jax.numpy as jnp
from jax.experimental import pallas as pl
from jax.experimental.pallas import tpu as pltpu


def _round_up(x, m):
    return (x + m - 1) // m * m


def _lp_kernel(feats_ref, fs_t_ref, lbl_ref, lblsp_ref, glbl_ref, mask_ref,
               out_ref, *, inv_temp, num_groups, group):
    """One grid step: a block of `tb` queries vs. the full support set."""
    # (tb, Cp) @ (Cp, N_s) -> (tb, N_s); bf16 operands, f32 MXU accumulation.
    sim = jnp.dot(feats_ref[...], fs_t_ref[...],
                  preferred_element_type=jnp.float32)

    # Hardest positive: exact element-wise min over positives, taken on the
    # raw similarities (exp is monotone, temp > 0, so reduce BEFORE exp).
    is_pos = lbl_ref[...] == lblsp_ref[...]                      # (tb, N_s)
    pos_min = jnp.min(jnp.where(is_pos, sim, jnp.inf),
                      axis=-1, keepdims=True)                    # (tb, 1)

    # Hardest negative per label group.  Support columns are permuted
    # host-side so that column k*num_groups + g holds element k of group g:
    # the per-group max is (group-1) element-wise maxima over contiguous,
    # lane-dense (tb, num_groups) slices (pure VPU, no XLU per group).
    gmax = sim[:, 0:num_groups]
    for k in range(1, group):                                    # static, small
        gmax = jnp.maximum(gmax, sim[:, k * num_groups:(k + 1) * num_groups])

    # Groups are label-homogeneous, so "group has a positive" is a compare.
    is_pos_group = lbl_ref[...] == glbl_ref[...]                 # (tb, NG)

    # exp only on the reduced values: (tb, 1) + (tb, NG), not (tb, N_s).
    pos = jnp.exp(pos_min * inv_temp)                            # (tb, 1)
    neg = jnp.where(is_pos_group, 0.0, jnp.exp(gmax * inv_temp)) # (tb, NG)
    neg_sum = jnp.sum(neg, axis=-1, keepdims=True)               # (tb, 1)

    row_loss = -jnp.log(pos / (pos + neg_sum + 1e-6) + 1e-6)     # (tb, 1)

    # Zero out padded query rows (select blocks any NaN from padded rows).
    row_loss = jnp.where(mask_ref[...] > 0.0, row_loss, 0.0)

    # Lane-dense unmasked store of the per-block partial sum.
    partial_sum = jnp.sum(row_loss, axis=0, keepdims=True)       # (1, 1)
    out_ref[0] = jnp.broadcast_to(partial_sum, (8, 128))


def criterion_lp(feats, feats_s, labels, labels_s, *, topk, num_instances,
                 temp, tb=128, compute_dtype=jnp.bfloat16):
    """Pallas implementation of CriterionLP.forward.  Returns a scalar loss."""
    B, C = feats.shape
    B_s = feats_s.shape[0]
    C_s = feats_s.shape[-1]
    assert C == C_s, "query / support feature dims must match"

    fs_flat = feats_s.reshape(B_s * topk, C_s)
    N_s = fs_flat.shape[0]
    G = topk * num_instances
    assert N_s % G == 0, "support must tile into topk*num_instances groups"
    NG = N_s // G

    # ---- host-side glue (cheap XLA ops, run once per call) ---------------
    # Permute support columns: new column k*NG + g  <-  original g*G + k.
    fs_perm = fs_flat.reshape(NG, G, C).transpose(1, 0, 2).reshape(N_s, C)
    lbls_perm = (labels_s.astype(jnp.int32).reshape(NG, G)
                 .transpose(1, 0).reshape(1, N_s))
    glabels = labels_s.astype(jnp.int32).reshape(NG, G)[:, 0].reshape(1, NG)

    # Pad the contraction dim to a lane multiple; pad B to a tile multiple.
    Cp = _round_up(C, 128)
    tb = _round_up(max(1, min(tb, B)), 8)      # cap tile at the batch size
    Bp = _round_up(B, tb)
    nb = Bp // tb

    feats_p = jnp.pad(feats.astype(jnp.float32), ((0, Bp - B), (0, Cp - C)))
    fs_t = jnp.pad(jnp.transpose(fs_perm).astype(jnp.float32),
                   ((0, Cp - C), (0, 0)))                         # (Cp, N_s)
    lbl_p = jnp.pad(labels.astype(jnp.int32), (0, Bp - B),
                    mode="edge").reshape(Bp, 1)
    row_mask = (jnp.arange(Bp) < B).astype(jnp.float32).reshape(Bp, 1)

    # bf16 operands for the MXU; all post-matmul math stays in f32.
    feats_p = feats_p.astype(compute_dtype)
    fs_t = fs_t.astype(compute_dtype)

    kernel = partial(_lp_kernel, inv_temp=1.0 / temp,
                     num_groups=NG, group=G)

    # Raise scoped VMEM above the 32 MiB default when the resident support
    # tile is large (physical: 128 MiB v5e/v6e, 64 MiB v7x).
    itemsize = jnp.dtype(compute_dtype).itemsize
    est = (2 * Cp * N_s * itemsize          # resident support (double-buffered)
           + 2 * tb * Cp * itemsize         # feats blocks
           + 4 * tb * N_s * 4               # sim / temporaries
           + (4 << 20))
    vmem_limit = int(min(max(est, 32 * 1024 * 1024), 96 * 1024 * 1024))

    out = pl.pallas_call(
        kernel,
        out_shape=jax.ShapeDtypeStruct((nb, 8, 128), jnp.float32),
        grid_spec=pltpu.PrefetchScalarGridSpec(
            num_scalar_prefetch=0,
            grid=(nb,),
            in_specs=[
                pl.BlockSpec((tb, Cp), lambda i: (i, 0)),    # query block
                pl.BlockSpec((Cp, N_s), lambda i: (0, 0)),   # support (resident)
                pl.BlockSpec((tb, 1), lambda i: (i, 0)),     # query labels
                pl.BlockSpec((1, N_s), lambda i: (0, 0)),    # permuted sup. labels
                pl.BlockSpec((1, NG), lambda i: (0, 0)),     # per-group labels
                pl.BlockSpec((tb, 1), lambda i: (i, 0)),     # row validity mask
            ],
            out_specs=pl.BlockSpec((1, 8, 128), lambda i: (i, 0, 0)),
        ),
        compiler_params=pltpu.CompilerParams(
            dimension_semantics=("parallel",),
            vmem_limit_bytes=vmem_limit),
    )(feats_p, fs_t, lbl_p, lbls_perm, glabels, row_mask)

    # Per-block partial sums are replicated across the (8, 128) tile.
    return jnp.sum(out[:, 0, 0]) / B


def _ref_loss_numpy(feats, feats_s, labels, labels_s, temp, topk, num_instances):
    """Direct numpy transcription of the PyTorch forward (normal try-path)."""
    B = feats.shape[0]
    fs = feats_s.reshape(-1, feats_s.shape[-1])
    e = np.exp(feats @ fs.T / temp)
    G = topk * num_instances
    loss = 0.0
    for i in range(B):
        is_pos = labels_s == labels[i]
        is_neg = ~is_pos
        pos = e[i][is_pos].min()
        negs = e[i][is_neg].reshape(-1, G).max(axis=1)
        loss += -np.log(pos / (pos + negs.sum() + 1e-6) + 1e-6)
    return loss / B


if __name__ == "__main__":
    # args of CriterionLP
    topk = 4
    num_instances = 2
    temp_lp_loss = 0.1

    # small shapes consistent with the forward
    B, C = 16, 32             # queries
    B_s = 16                  # support rows (each carries topk features)
    N_s = B_s * topk          # 64 flattened support instances
    G = topk * num_instances  # 8 -> 8 label groups

    key = jax.random.PRNGKey(0)
    k1, k2 = jax.random.split(key)
    feats = jax.random.normal(k1, (B, C), dtype=jnp.float32)
    feats_s = jax.random.normal(k2, (B_s, topk, C), dtype=jnp.float32)
    # L2-normalize (as features typically are upstream of this loss)
    feats = feats / jnp.linalg.norm(feats, axis=-1, keepdims=True)
    feats_s = feats_s / jnp.linalg.norm(feats_s, axis=-1, keepdims=True)

    # support labels tile in whole groups of size topk*num_instances
    labels_s = jnp.asarray(np.repeat(np.arange(N_s // G, dtype=np.int32), G))
    labels = jnp.asarray((np.arange(B) % (N_s // G)).astype(np.int32))

    loss = criterion_lp(feats, feats_s, labels, labels_s,
                        topk=topk, num_instances=num_instances,
                        temp=temp_lp_loss)
    loss = float(jax.block_until_ready(loss))

    # Reference 1: same math on the exact bf16-rounded inputs the MXU consumes.
    f_bf = np.asarray(feats.astype(jnp.bfloat16).astype(jnp.float32), np.float64)
    fs_bf = np.asarray(feats_s.astype(jnp.bfloat16).astype(jnp.float32), np.float64)
    ref_bf = _ref_loss_numpy(f_bf, fs_bf, np.asarray(labels),
                             np.asarray(labels_s), temp_lp_loss, topk,
                             num_instances)
    # Reference 2: full-precision inputs (bounds the bf16 MXU approximation).
    ref_fp = _ref_loss_numpy(np.asarray(feats, np.float64),
                             np.asarray(feats_s, np.float64),
                             np.asarray(labels), np.asarray(labels_s),
                             temp_lp_loss, topk, num_instances)

    assert np.isfinite(loss)
    assert np.allclose(loss, float(ref_bf), rtol=2e-3, atol=1e-4), \
        f"pallas={loss} ref(bf16 inputs)={float(ref_bf)}"
    assert np.allclose(loss, float(ref_fp), rtol=5e-2, atol=5e-2), \
        f"pallas={loss} ref(f32 inputs)={float(ref_fp)}"
    print("KERNEL_OK")
</pallas_src>

<mosaic_0001>
module attributes {stable_mosaic.version = 11 : i64} {
  func.func @_lp_kernel(%arg0: i32, %arg1: memref<16x128xbf16, #tpu.memory_space<vmem>>, %arg2: memref<128x64xbf16, #tpu.memory_space<vmem>>, %arg3: memref<16x1xi32, #tpu.memory_space<vmem>>, %arg4: memref<1x64xi32, #tpu.memory_space<vmem>>, %arg5: memref<1x8xi32, #tpu.memory_space<vmem>>, %arg6: memref<16x1xf32, #tpu.memory_space<vmem>>, %arg7: memref<1x8x128xf32, #tpu.memory_space<vmem>>) attributes {dimension_semantics = [#tpu.dimension_semantics<parallel>], iteration_bounds = array<i64: 1>, scalar_prefetch = 0 : i64, scratch_operands = 0 : i64, tpu.core_type = #tpu.core_type<tc>, window_params = [{transform_indices = @transform_0, window_bounds = array<i64: 16, 128>}, {pipeline_mode = #tpu.pipeline_mode<synchronous>, transform_indices = @transform_1, window_bounds = array<i64: 128, 64>}, {transform_indices = @transform_2, window_bounds = array<i64: 16, 1>}, {pipeline_mode = #tpu.pipeline_mode<synchronous>, transform_indices = @transform_3, window_bounds = array<i64: 1, 64>}, {pipeline_mode = #tpu.pipeline_mode<synchronous>, transform_indices = @transform_4, window_bounds = array<i64: 1, 8>}, {transform_indices = @transform_5, window_bounds = array<i64: 16, 1>}, {transform_indices = @transform_6, window_bounds = array<i64: 1, 8, 128>}]} {
    %c0 = arith.constant 0 : index
    %c0_0 = arith.constant 0 : index
    %0 = vector.load %arg1[%c0, %c0_0] : memref<16x128xbf16, #tpu.memory_space<vmem>>, vector<16x128xbf16>
    %c0_1 = arith.constant 0 : index
    %c0_2 = arith.constant 0 : index
    %1 = vector.load %arg2[%c0_1, %c0_2] : memref<128x64xbf16, #tpu.memory_space<vmem>>, vector<128x64xbf16>
    %cst = arith.constant dense<0.000000e+00> : vector<16x64xf32>
    %2 = tpu.matmul %0, %1, %cst {dimension_numbers = #tpu.dot_dimension_numbers<[1], [0], [0], [1], [0, 0, 1, 1], [], []>} : vector<16x128xbf16>, vector<128x64xbf16>, vector<16x64xf32> -> vector<16x64xf32>
    %c0_3 = arith.constant 0 : index
    %c0_4 = arith.constant 0 : index
    %3 = vector.load %arg3[%c0_3, %c0_4] : memref<16x1xi32, #tpu.memory_space<vmem>>, vector<16x1xi32>
    %c0_5 = arith.constant 0 : index
    %c0_6 = arith.constant 0 : index
    %4 = vector.load %arg4[%c0_5, %c0_6] : memref<1x64xi32, #tpu.memory_space<vmem>>, vector<1x64xi32>
    %5 = vector.broadcast %3 : vector<16x1xi32> to vector<16x64xi32>
    %6 = vector.broadcast %4 : vector<1x64xi32> to vector<16x64xi32>
    %7 = arith.cmpi eq, %5, %6 : vector<16x64xi32>
    %cst_7 = arith.constant 0x7F800000 : f32
    %8 = vector.broadcast %cst_7 : f32 to vector<16x64xf32>
    %9 = arith.select %7, %2, %8 : vector<16x64xi1>, vector<16x64xf32>
    %cst_8 = arith.constant dense<0x7F800000> : vector<16xf32>
    %10 = vector.multi_reduction <minimumf>, %9, %cst_8 [1] : vector<16x64xf32> to vector<16xf32>
    %11 = vector.shape_cast %10 : vector<16xf32> to vector<16x1xf32>
    %12 = vector.extract_strided_slice %2 {offsets = [0, 0], sizes = [16, 8], strides = [1, 1]} : vector<16x64xf32> to vector<16x8xf32>
    %13 = vector.extract_strided_slice %2 {offsets = [0, 8], sizes = [16, 8], strides = [1, 1]} : vector<16x64xf32> to vector<16x8xf32>
    %14 = arith.maximumf %12, %13 : vector<16x8xf32>
    %15 = vector.extract_strided_slice %2 {offsets = [0, 16], sizes = [16, 8], strides = [1, 1]} : vector<16x64xf32> to vector<16x8xf32>
    %16 = arith.maximumf %14, %15 : vector<16x8xf32>
    %17 = vector.extract_strided_slice %2 {offsets = [0, 24], sizes = [16, 8], strides = [1, 1]} : vector<16x64xf32> to vector<16x8xf32>
    %18 = arith.maximumf %16, %17 : vector<16x8xf32>
    %19 = vector.extract_strided_slice %2 {offsets = [0, 32], sizes = [16, 8], strides = [1, 1]} : vector<16x64xf32> to vector<16x8xf32>
    %20 = arith.maximumf %18, %19 : vector<16x8xf32>
    %21 = vector.extract_strided_slice %2 {offsets = [0, 40], sizes = [16, 8], strides = [1, 1]} : vector<16x64xf32> to vector<16x8xf32>
    %22 = arith.maximumf %20, %21 : vector<16x8xf32>
    %23 = vector.extract_strided_slice %2 {offsets = [0, 48], sizes = [16, 8], strides = [1, 1]} : vector<16x64xf32> to vector<16x8xf32>
    %24 = arith.maximumf %22, %23 : vector<16x8xf32>
    %25 = vector.extract_strided_slice %2 {offsets = [0, 56], sizes = [16, 8], strides = [1, 1]} : vector<16x64xf32> to vector<16x8xf32>
    %26 = arith.maximumf %24, %25 : vector<16x8xf32>
    %c0_9 = arith.constant 0 : index
    %c0_10 = arith.constant 0 : index
    %27 = vector.load %arg3[%c0_9, %c0_10] : memref<16x1xi32, #tpu.memory_space<vmem>>, vector<16x1xi32>
    %c0_11 = arith.constant 0 : index
    %c0_12 = arith.constant 0 : index
    %28 = vector.load %arg5[%c0_11, %c0_12] : memref<1x8xi32, #tpu.memory_space<vmem>>, vector<1x8xi32>
    %29 = vector.broadcast %27 : vector<16x1xi32> to vector<16x8xi32>
    %30 = vector.broadcast %28 : vector<1x8xi32> to vector<16x8xi32>
    %31 = arith.cmpi eq, %29, %30 : vector<16x8xi32>
    %cst_13 = arith.constant 1.000000e+01 : f32
    %32 = vector.broadcast %cst_13 : f32 to vector<16x1xf32>
    %33 = arith.mulf %11, %32 : vector<16x1xf32>
    %34 = math.exp %33 : vector<16x1xf32>
    %cst_14 = arith.constant 1.000000e+01 : f32
    %35 = vector.broadcast %cst_14 : f32 to vector<16x8xf32>
    %36 = arith.mulf %26, %35 : vector<16x8xf32>
    %37 = math.exp %36 : vector<16x8xf32>
    %cst_15 = arith.constant 0.000000e+00 : f32
    %38 = vector.broadcast %cst_15 : f32 to vector<16x8xf32>
    %39 = arith.select %31, %38, %37 : vector<16x8xi1>, vector<16x8xf32>
    %cst_16 = arith.constant dense<0.000000e+00> : vector<16xf32>
    %40 = vector.multi_reduction <add>, %39, %cst_16 [1] : vector<16x8xf32> to vector<16xf32>
    %41 = vector.shape_cast %40 : vector<16xf32> to vector<16x1xf32>
    %42 = arith.addf %34, %41 : vector<16x1xf32>
    %cst_17 = arith.constant 9.99999997E-7 : f32
    %43 = vector.broadcast %cst_17 : f32 to vector<16x1xf32>
    %44 = arith.addf %42, %43 : vector<16x1xf32>
    %45 = arith.divf %34, %44 : vector<16x1xf32>
    %cst_18 = arith.constant 9.99999997E-7 : f32
    %46 = vector.broadcast %cst_18 : f32 to vector<16x1xf32>
    %47 = arith.addf %45, %46 : vector<16x1xf32>
    %48 = math.log %47 : vector<16x1xf32>
    %cst_19 = arith.constant 0.000000e+00 : f32
    %49 = vector.broadcast %cst_19 : f32 to vector<16x1xf32>
    %50 = arith.subf %49, %48 : vector<16x1xf32>
    %c0_20 = arith.constant 0 : index
    %c0_21 = arith.constant 0 : index
    %51 = vector.load %arg6[%c0_20, %c0_21] : memref<16x1xf32, #tpu.memory_space<vmem>>, vector<16x1xf32>
    %cst_22 = arith.constant 0.000000e+00 : f32
    %52 = vector.broadcast %cst_22 : f32 to vector<16x1xf32>
    %53 = arith.cmpf ogt, %51, %52 : vector<16x1xf32>
    %cst_23 = arith.constant 0.000000e+00 : f32
    %54 = vector.broadcast %cst_23 : f32 to vector<16x1xf32>
    %55 = arith.select %53, %50, %54 : vector<16x1xi1>, vector<16x1xf32>
    %cst_24 = arith.constant dense<0.000000e+00> : vector<1xf32>
    %56 = vector.multi_reduction <add>, %55, %cst_24 [0] : vector<16x1xf32> to vector<1xf32>
    %57 = vector.shape_cast %56 : vector<1xf32> to vector<1x1xf32>
    %58 = vector.shape_cast %57 : vector<1x1xf32> to vector<1x1xf32>
    %59 = vector.broadcast %58 : vector<1x1xf32> to vector<8x128xf32>
    %c0_25 = arith.constant 0 : index
    %c0_26 = arith.constant 0 : index
    %c0_27 = arith.constant 0 : index
    %60 = vector.load %arg7[%c0_25, %c0_26, %c0_27] : memref<1x8x128xf32, #tpu.memory_space<vmem>>, vector<1x8x128xf32>
    %61 = vector.shape_cast %60 : vector<1x8x128xf32> to vector<8x128xf32>
    %62 = vector.shape_cast %59 : vector<8x128xf32> to vector<1x8x128xf32>
    tpu.vector_store %arg7[%c0_25, %c0_26, %c0_27], %62 {strides = array<i32>} : memref<1x8x128xf32, #tpu.memory_space<vmem>>, vector<1x8x128xf32>,
    return
  }
  func.func @transform_0(%arg0: i32) -> (i32, i32) {
    %c0_i32 = arith.constant 0 : i32
    %c0_i32_0 = arith.constant 0 : i32
    return %arg0, %c0_i32 : i32, i32
  }
  func.func @transform_1(%arg0: i32) -> (i32, i32) {
    %c0_i32 = arith.constant 0 : i32
    %c0_i32_0 = arith.constant 0 : i32
    %c0_i32_1 = arith.constant 0 : i32
    return %c0_i32, %c0_i32_0 : i32, i32
  }
  func.func @transform_2(%arg0: i32) -> (i32, i32) {
    %c0_i32 = arith.constant 0 : i32
    %c0_i32_0 = arith.constant 0 : i32
    return %arg0, %c0_i32 : i32, i32
  }
  func.func @transform_3(%arg0: i32) -> (i32, i32) {
    %c0_i32 = arith.constant 0 : i32
    %c0_i32_0 = arith.constant 0 : i32
    %c0_i32_1 = arith.constant 0 : i32
    return %c0_i32, %c0_i32_0 : i32, i32
  }
  func.func @transform_4(%arg0: i32) -> (i32, i32) {
    %c0_i32 = arith.constant 0 : i32
    %c0_i32_0 = arith.constant 0 : i32
    %c0_i32_1 = arith.constant 0 : i32
    return %c0_i32, %c0_i32_0 : i32, i32
  }
  func.func @transform_5(%arg0: i32) -> (i32, i32) {
    %c0_i32 = arith.constant 0 : i32
    %c0_i32_0 = arith.constant 0 : i32
    return %arg0, %c0_i32 : i32, i32
  }
  func.func @transform_6(%arg0: i32) -> (i32, i32, i32) {
    %c0_i32 = arith.constant 0 : i32
    %c0_i32_0 = arith.constant 0 : i32
    %c0_i32_1 = arith.constant 0 : i32
    return %arg0, %c0_i32, %c0_i32_0 : i32, i32, i32
  }
}

</mosaic_0001>

<bundles_post_ra>
// kernel: tpu_custom_call.1
= control target key start
LH: loop header
LB: loop body
LE: loop exit
PB: predicated region body
PF: predicated region fallthrough
CT: control target
= control target key end

     0   :  { %s502_s0 = inlined_call_operand.vmem [shape: bf16[16,128], index: 0, kind: input, shape index: {}]   ;;  %s503_s1 = inlined_call_operand.vmem [shape: bf16[128,64], index: 1, kind: input, shape index: {}]   ;;  %s504_s2 = inlined_call_operand.vmem [shape: s32[16,1], index: 2, kind: input, shape index: {}]   ;;  %s505_s3 = inlined_call_operand.vmem [shape: s32[1,64], index: 3, kind: input, shape index: {}]   ;;  %s506_s4 = inlined_call_operand.vmem [shape: s32[1,8], index: 4, kind: input, shape index: {}]   ;;  %s507_s5 = inlined_call_operand.vmem [shape: f32[16,1], index: 5, kind: input, shape index: {}]   ;;  %s508_s6 = inlined_call_operand.hbm [shape: f32[1,8,128], index: 6, kind: output, shape index: {}]  }
   0x1   :  { %v338_v0 = vld [vmem:[%s503_s1 + $0x38] sm:$0xff]  ;;  %v337_v1 = vld [vmem:[%s503_s1 + $0x30] sm:$0xff] }
   0x2   :  { %96 = vmatpush.bf16.msra.mxu0 %v338_v0 }
   0x3   :  { %11 = vsyncpa [#allocation3], 0  ;;  %v336_v2 = vld [vmem:[%s503_s1 + $0x28] sm:$0xff]  ;;  %v335_v3 = vld [vmem:[%s503_s1 + $0x20] sm:$0xff]  ;;  %v395_v9 = vmov 0   ;;  %s396_s15 = smov 104  }
   0x4   :  { %v334_v4 = vld [vmem:[%s503_s1 + $0x18] sm:$0xff]  ;;  %v333_v5 = vld [vmem:[%s503_s1 + $0x10] sm:$0xff]  ;;  %v332_v6 = vld [vmem:[%s503_s1 + $0x8] sm:$0xff]  ;;  %348 = vset.pattern.permute.xlu2 %v395_v9  ;;  %349 = vset.pattern.permute.xlu0 %v395_v9  ;;  %s397_s16 = smov 112   ;;  %s398_s17 = smov 120   ;;  %vm124_vm0 = vcmask 523264  }
   0x5   :  { %v331_v7 = vld [vmem:[%s503_s1] sm:$0xff]  ;;  %350 = vset.pattern.permute.xlu1 %v395_v9  ;;  %s399_s18 = smov 88   ;;  %s400_s1 = smov 80   ;;  %v111_v13 = vld [vmem:[%s504_s2 + $0x8] sm:$0xff]  ;;  %vm207_vm3 = vcmask 64512  }
   0x6   :  { %97 = vmatpush.bf16.msra.mxu0 %v337_v1  ;;  %v330_v8 = vld [vmem:[%s502_s0] sm:$0xff]  ;;  %s401_s19 = smov 96   ;;  %s402_s0 = smov 72  }
   0x7   :  { %v110_v12 = vld [vmem:[%s504_s2] sm:$0xff]  ;;  %s403_s29 = smov [#allocation2]   ;;  %s285_s8 = sshll.u32 %s508_s6, 4  ;;  %s286_s8 = int_to_ptr.hbm [resolvable:$true] %s285_s8 }
   0x8   :  { %v351_v22 = vld [vmem:[%s505_s3] ss:$0 sm:$0xff] }
   0x9   :  { %v352_v37 = vld [vmem:[%s506_s4] ss:$0 sm:$0xff] }
   0xa   :  { %98 = vmatpush.bf16.msra.mxu0 %v336_v2 }
   0xe   :  { %99 = vmatpush.bf16.msra.mxu0 %v335_v3 }
  0x12   :  { %100 = vmatpush.bf16.msra.mxu0 %v334_v4 }
  0x16   :  { %101 = vmatpush.bf16.msra.mxu0 %v333_v5 }
  0x1a   :  { %102 = vmatpush.bf16.msra.mxu0 %v332_v6 }
  0x1e   :  { %103 = vmatpush.bf16.msra.mxu0 %v331_v7 }
  0x21   :  { %104 = vmatmul.bf16.vlgmr.msra.gmra.mxu0 %v330_v8 }
  0x9e   :  { %v105_v10 = vpop.f32.mrf.mxu0 }
  0x9f   :  { %149 = vrot.lane.b32.xlu2 %v105_v10, %s396_s15  ;;  %141 = vrot.lane.b32.xlu1 %v105_v10, %s397_s16 }
  0xa0   :  { %133 = vrot.lane.b32.xlu0 %v105_v10, %s398_s17 }
  0xa6   :  { %v466_v11 = vpop.f32.mrf.mxu0 }
  0xa7   :  { %165 = vrot.lane.b32.xlu2 %v105_v10, %s399_s18  ;;  %173 = vrot.lane.b32.xlu1 %v105_v10, %s400_s1 }
  0xa8   :  { %157 = vrot.lane.b32.xlu0 %v105_v10, %s401_s19 }
  0xaf   :  { %151 = vrot.lane.b32.xlu2 %v466_v11, %s396_s15  ;;  %143 = vrot.lane.b32.xlu1 %v466_v11, %s397_s16 }
  0xb0   :  { %181 = vrot.lane.b32.xlu0 %v105_v10, %s402_s0 }
  0xb7   :  { %175 = vrot.lane.b32.xlu2 %v466_v11, %s400_s1  ;;  %159 = vrot.lane.b32.xlu1 %v466_v11, %s401_s19 }
  0xb8   :  { %135 = vrot.lane.b32.xlu0 %v466_v11, %s398_s17 }
  0xbf   :  { %114 = vperm.xlu2 %348, %v110_v12   ;;  %183 = vrot.lane.b32.xlu1 %v466_v11, %s402_s0 }
  0xc0   :  { %167 = vrot.lane.b32.xlu0 %v466_v11, %s399_s18 }
  0xc8   :  { %117 = vperm.xlu0 %349, %v111_v13  }
  0xf9   :  { %v150_v14 = vpop.permute.xlu2 %149 }
 0x101   :  { %v166_v15 = vpop.permute.xlu2 %165 }
 0x109   :  { %v152_v16 = vpop.permute.xlu2 %151 }
 0x111   :  { %v142_v17 = vpop.permute.xlu1 %141  ;;  %v176_v18 = vpop.permute.xlu2 %175 }
 0x112   :  { %v134_v19 = vpop.permute.xlu0 %133 }
 0x113   :  { %v139_v20 = vmax.f32 %v105_v10, %v134_v19 }
 0x115   :  { %v147_v21 = vmax.f32 %v139_v20, %v142_v17 }
 0x117   :  { %v155_v24 = vmax.f32 %v147_v21, %v150_v14 }
 0x119   :  { %v174_v23 = vpop.permute.xlu1 %173  ;;  %v115_v25 = vpop.permute.xlu2 %114 }
 0x11a   :  { %v158_v26 = vpop.permute.xlu0 %157  ;;  %vm120_vm1 = vcmp.eq.s32.totalorder %v115_v25, %v351_v22  ;;  %vm191_vm2 = vcmp.eq.s32.totalorder %v115_v25, %v352_v37 }
 0x11b   :  { %v163_v27 = vmax.f32 %v155_v24, %v158_v26  ;;  %v122_v28 = vsel %vm120_vm1, %v105_v10, inf }
 0x11c   :  { %v125_v29 = vsel %vm124_vm0, %v122_v28, inf }
 0x11d   :  { %v171_v30 = vmax.f32 %v163_v27, %v166_v15  ;;  %126 = vmin.xlane.f32.xlu1 %v125_v29 }
 0x11f   :  { %v179_v31 = vmax.f32 %v171_v30, %v174_v23 }
 0x121   :  { %v144_v33 = vpop.permute.xlu1 %143 }
 0x122   :  { %v182_v32 = vpop.permute.xlu0 %181 }
 0x123   :  { %v187_v34 = vmax.f32 %v179_v31, %v182_v32 }
 0x125   :  { %v199_v35 = vmul.f32 10.0, %v187_v34 }
 0x127   :  { %v201_v36 = vmul.f32 1.442695, %v199_v35 }
 0x129   :  { %353 = vpow2.f32 %v201_v36  ;;  %v160_v40 = vpop.permute.xlu1 %159  ;;  %v256_v36 = vld [vmem:[%s507_s5] sm:$0xff] }
 0x12a   :  { %v136_v38 = vpop.permute.xlu0 %135  ;;  %vm258_vm14 = vcmp.gt.f32.partialorder %v256_v36, 0.0 }
 0x12b   :  { %v140_v39 = vmax.f32 %v466_v11, %v136_v38  ;;  %v257_v38 = vld [vmem:[%s507_s5 + $0x8] sm:$0xff]  ;;  %s283_s5 = sshll.u32 %s403_s29, 4  ;;  %s284_s5 = int_to_ptr.vmem [resolvable:$true] %s283_s5 }
 0x12c   :  { %vm259_vm15 = vcmp.gt.f32.partialorder %v257_v38, 0.0 }
 0x12d   :  { %v148_v41 = vmax.f32 %v140_v39, %v144_v33 }
 0x12f   :  { %v354_v42 = vpop.eup %353  ;;  %v156_v43 = vmax.f32 %v148_v41, %v152_v16 }
 0x130   :  { %v205_v44 = vsel %vm191_vm2, 0.0, %v354_v42 }
 0x131   :  { %v208_v45 = vsel %vm207_vm3, %v205_v44, 0.0  ;;  %v164_v46 = vmax.f32 %v156_v43, %v160_v40  ;;  %v184_v50 = vpop.permute.xlu1 %183 }
 0x132   :  { %209 = vadd.xlane.f32.xlu0 %v208_v45  ;;  %v168_v47 = vpop.permute.xlu0 %167 }
 0x133   :  { %v172_v48 = vmax.f32 %v164_v46, %v168_v47 }
 0x135   :  { %v180_v49 = vmax.f32 %v172_v48, %v176_v18 }
 0x137   :  { %v188_v51 = vmax.f32 %v180_v49, %v184_v50 }
 0x139   :  { %v200_v52 = vmul.f32 10.0, %v188_v51 }
 0x13a   :  { %v118_v53 = vpop.permute.xlu0 %117 }
 0x13b   :  { %v203_v54 = vmul.f32 1.442695, %v200_v52  ;;  %vm121_vm4 = vcmp.eq.s32.totalorder %v118_v53, %v351_v22  ;;  %vm192_vm5 = vcmp.eq.s32.totalorder %v118_v53, %v352_v37 }
 0x13c   :  { %v123_v55 = vsel %vm121_vm4, %v466_v11, inf }
 0x13d   :  { %355 = vpow2.f32 %v203_v54  ;;  %v128_v56 = vsel %vm124_vm0, %v123_v55, inf  ;;  %vm262_vm0 = vcmask 7168  }
 0x13e   :  { %129 = vmin.xlane.f32.xlu2 %v128_v56 }
 0x143   :  { %v356_v57 = vpop.eup %355 }
 0x144   :  { %v206_v58 = vsel %vm192_vm5, 0.0, %v356_v57 }
 0x145   :  { %v211_v59 = vsel %vm207_vm3, %v206_v58, 0.0 }
 0x146   :  { %212 = vadd.xlane.f32.xlu2 %v211_v59 }
 0x190   :  { %v127_v60 = vpop.xlane.xlu1 %126 }
 0x191   :  { %v193_v61 = vmul.f32 10.0, %v127_v60 }
 0x193   :  { %v195_v62 = vmul.f32 1.442695, %v193_v61 }
 0x195   :  { %357 = vpow2.f32 %v195_v62 }
 0x19b   :  { %v358_v63 = vpop.eup %357 }
 0x1a5   :  { %v210_v0 = vpop.xlane.xlu0 %209 }
 0x1a6   :  { %v214_v1 = vadd.f32 %v358_v63, %v210_v0 }
 0x1a8   :  { %v216_v2 = vadd.f32 1e-06, %v214_v1 }
 0x1aa   :  { %359 = vrcp.f32 %v216_v2  ;;  %v229_v13 = vand.u32 2147483648, %v216_v2  ;;  %vm223_vm7 = vweird.f32 %v216_v2  ;;  %v227_v15 = vand.u32 2147483647, %v216_v2 }
 0x1ac   :  { %v230_v18 = vor.u32 1.1754944e-38, %v229_v13  ;;  %vm228_vm9 = vcmp.eq.f32.partialorder %v227_v15, 8.507059e+37 }
 0x1b0   :  { %v360_v3 = vpop.eup %359 }
 0x1b1   :  { %v219_v4 = vmul.f32 %v360_v3, %v216_v2  ;;  %v130_v5 = vpop.xlane.xlu2 %129  ;;  %vm224_vm6 = vweird.f32 %v360_v3 }
 0x1b2   :  { %v194_v6 = vmul.f32 10.0, %v130_v5  ;;  %vm225_vm8 = vmor %vm223_vm7, %vm224_vm6 }
 0x1b3   :  { %v220_v7 = vsub.f32 1.0, %v219_v4 }
 0x1b4   :  { %v197_v8 = vmul.f32 1.442695, %v194_v6 }
 0x1b5   :  { %v221_v9 = vmul.f32 %v360_v3, %v220_v7 }
 0x1b6   :  { %361 = vpow2.f32 %v197_v8 }
 0x1b7   :  { %v222_v11 = vadd.f32 %v360_v3, %v221_v9 }
 0x1b9   :  { %v213_v12 = vpop.xlane.xlu2 %212  ;;  %v226_v17 = vsel %vm225_vm8, %v360_v3, %v222_v11 }
 0x1ba   :  { %v231_v19 = vsel %vm228_vm9, %v230_v18, %v226_v17 }
 0x1bb   :  { %v232_v20 = vmul.f32 %v358_v63, %v231_v19 }
 0x1bc   :  { %v362_v10 = vpop.eup %361 }
 0x1bd   :  { %v215_v14 = vadd.f32 %v362_v10, %v213_v12  ;;  %v248_v24 = vadd.f32 1e-06, %v232_v20 }
 0x1bf   :  { %v217_v16 = vadd.f32 1e-06, %v215_v14 }
 0x1c1   :  { %363 = vrcp.f32 %v217_v16  ;;  %v244_v25 = vand.u32 2147483648, %v217_v16  ;;  %v242_v27 = vand.u32 2147483647, %v217_v16  ;;  %vm238_vm11 = vweird.f32 %v217_v16 }
 0x1c2   :  { %365 = vlog2.f32 %v248_v24 }
 0x1c3   :  { %v245_v29 = vor.u32 1.1754944e-38, %v244_v25  ;;  %vm243_vm13 = vcmp.eq.f32.partialorder %v242_v27, 8.507059e+37 }
 0x1c7   :  { %v364_v21 = vpop.eup %363 }
 0x1c8   :  { %v234_v22 = vmul.f32 %v364_v21, %v217_v16  ;;  %vm239_vm10 = vweird.f32 %v364_v21  ;;  %v366_v33 = vpop.eup %365 }
 0x1c9   :  { %vm240_vm12 = vmor %vm238_vm11, %vm239_vm10  ;;  %v251_v35 = vmul.f32 0.6931472, %v366_v33 }
 0x1ca   :  { %v235_v23 = vsub.f32 1.0, %v234_v22 }
 0x1cb   :  { %v254_v37 = vsub.f32 0.0, %v251_v35 }
 0x1cc   :  { %v236_v26 = vmul.f32 %v364_v21, %v235_v23 }
 0x1cd   :  { %v260_v42 = vsel %vm258_vm14, %v254_v37, 0.0 }
 0x1ce   :  { %v237_v28 = vadd.f32 %v364_v21, %v236_v26  ;;  %v263_v44 = vsel %vm262_vm0, %v260_v42, 0.0 }
 0x1d0   :  { %v241_v30 = vsel %vm240_vm12, %v364_v21, %v237_v28 }
 0x1d1   :  { %v246_v31 = vsel %vm243_vm13, %v245_v29, %v241_v30 }
 0x1d2   :  { %v247_v32 = vmul.f32 %v362_v10, %v246_v31 }
 0x1d4   :  { %v249_v34 = vadd.f32 1e-06, %v247_v32 }
 0x1d6   :  { %367 = vlog2.f32 %v249_v34 }
 0x1dc   :  { %v368_v39 = vpop.eup %367 }
 0x1dd   :  { %v253_v40 = vmul.f32 0.6931472, %v368_v39 }
 0x1df   :  { %v255_v41 = vsub.f32 0.0, %v253_v40 }
 0x1e1   :  { %v261_v43 = vsel %vm259_vm15, %v255_v41, 0.0 }
 0x1e2   :  { %v264_v45 = vsel %vm262_vm0, %v261_v43, 0.0 }
 0x1e3   :  { %v265_v46 = vadd.f32 %v264_v45, %v263_v44 }
 0x1e5   :  { %v266_v47 = vrot.slane %v265_v46, 4 }
 0x1e7   :  { %v267_v48 = vadd.f32 %v266_v47, %v265_v46 }
 0x1e9   :  { %v268_v49 = vrot.slane %v267_v48, 2 }
 0x1eb   :  { %v269_v50 = vadd.f32 %v268_v49, %v267_v48 }
 0x1ed   :  { %v270_v51 = vrot.slane %v269_v50, 1 }
 0x1ef   :  { %v271_v52 = vadd.f32 %v270_v51, %v269_v50 }
 0x1f1   :  { %274 = vperm.xlu1 %350, %v271_v52  }
 0x263   :  { %v275_v53 = vpop.permute.xlu1 %274 }
 0x264   :  { %277 = vst [vmem:[#allocation2] sm:$0xff] %v275_v53 }
 0x265   :  { %288 = dma.vmem_to_hbm [thread:$0]  %s284_s5, 128, %s286_s8, [#allocation3]  }
 0x266   :  { %393 = dma.done.wait [#allocation3], 128  }
 0x267   :  { %394 = vsyncadd [#allocation3], 4294967168 }
 0x268   :  { %293 = vsyncpa [#allocation3], 1 }

</bundles_post_ra>
